<compile_context>
chip_gen: v7x
topology: tpu7x:2x2x1
jax: 0.10.0
libtpu: 0.0.40
codegen_flags: <defaults>
</compile_context>

<pallas_src>
import functools

import jax
import jax.numpy as jnp
import numpy as np
from jax import lax
from jax.experimental import pallas as pl
from jax.experimental.pallas import tpu as pltpu


def _sma_kernel(x_ref, o_ref, *, kernel_size):
    """Box-filter smoothing along axis 0 (time) for one batch element."""
    x = x_ref[0].astype(jnp.float32)                 # (L, C), upcast in-vreg
    L, C = x.shape
    p = kernel_size // 2
    row = lax.broadcasted_iota(jnp.int32, (L, C), 0)

    acc = x
    for s in range(1, p + 1):
        # x[t - s] contributes at position t (zero where t - s < 0).
        fwd = pltpu.roll(x, shift=s, axis=0)
        acc = acc + jnp.where(row >= s, fwd, 0.0)
        # x[t + s] contributes at position t (zero where t + s >= L).
        bwd = pltpu.roll(x, shift=L - s, axis=0)
        acc = acc + jnp.where(row < L - s, bwd, 0.0)

    # count_include_pad=True (PyTorch default): divisor is always kernel_size.
    o_ref[0] = (acc * (1.0 / kernel_size)).astype(o_ref.dtype)


def simple_moving_average(x, kernel_size=3):
    """x: (B, L, C) -> smoothed (B, L, C), matching F.avg_pool1d semantics."""
    if kernel_size % 2 != 1:
        # TODO(synk): even kernel_size changes the output length (L+1) in the
        # reference module; only the odd case used there (3) is implemented.
        raise NotImplementedError("only odd kernel_size supported")
    B, L, C = x.shape
    assert kernel_size // 2 < L, "kernel half-width must be smaller than seq len"

    kernel = functools.partial(_sma_kernel, kernel_size=kernel_size)
    return pl.pallas_call(
        kernel,
        grid=(B,),
        # Block = full (L, C) slab per batch element: last two block dims equal
        # the full array dims, so the (8, 128) divisibility rule is satisfied
        # for arbitrary L / C, and C stays on the lane axis (lane-dense).
        in_specs=[pl.BlockSpec((1, L, C), lambda b: (b, 0, 0))],
        out_specs=pl.BlockSpec((1, L, C), lambda b: (b, 0, 0)),
        out_shape=jax.ShapeDtypeStruct((B, L, C), x.dtype),
        compiler_params=pltpu.CompilerParams(
            dimension_semantics=("parallel",)),  # batch items are independent
    )(x)


class SimpleMovingAveragePallas:
    """JAX/Pallas port of SimpleMovingAverage."""

    def __init__(self, kernel_size):
        self.kernel_size = kernel_size

    def forward(self, x):
        # The PyTorch permutes are pure layout plumbing; the kernel works on
        # the (B, L, C) feature-last layout directly.
        return simple_moving_average(x, self.kernel_size)

    __call__ = forward


def _reference_sma(x, kernel_size):
    """Pure-JAX reference (== avg_pool1d stride=1, pad=k//2, count_include_pad=True)."""
    p = kernel_size // 2
    xpad = jnp.pad(x.astype(jnp.float32), ((0, 0), (p, p), (0, 0)))
    L = x.shape[1]
    acc = sum(xpad[:, s:s + L, :] for s in range(kernel_size))
    return (acc / kernel_size).astype(x.dtype)


if __name__ == "__main__":
    key = jax.random.PRNGKey(0)
    B, L, C = 2, 8, 32  # batch=2, seq=8, hidden=32
    x = jax.random.normal(key, (B, L, C), dtype=jnp.float32)

    sma = SimpleMovingAveragePallas(kernel_size=3)
    y = sma(x)
    jax.block_until_ready(y)

    y_ref = _reference_sma(x, 3)
    np.testing.assert_allclose(np.asarray(y), np.asarray(y_ref),
                               rtol=1e-5, atol=1e-5)

    print("KERNEL_OK")
</pallas_src>

<mosaic_0001>
module attributes {stable_mosaic.version = 11 : i64} {
  func.func @_sma_kernel(%arg0: i32, %arg1: memref<1x8x32xf32, #tpu.memory_space<vmem>>, %arg2: memref<1x8x32xf32, #tpu.memory_space<vmem>>) attributes {dimension_semantics = [#tpu.dimension_semantics<parallel>], iteration_bounds = array<i64: 2>, scalar_prefetch = 0 : i64, scratch_operands = 0 : i64, tpu.core_type = #tpu.core_type<tc>, window_params = [{transform_indices = @transform_0, window_bounds = array<i64: 1, 8, 32>}, {transform_indices = @transform_1, window_bounds = array<i64: 1, 8, 32>}]} {
    %c0 = arith.constant 0 : index
    %c0_0 = arith.constant 0 : index
    %c0_1 = arith.constant 0 : index
    %0 = vector.load %arg1[%c0, %c0_0, %c0_1] : memref<1x8x32xf32, #tpu.memory_space<vmem>>, vector<1x8x32xf32>
    %1 = vector.shape_cast %0 : vector<1x8x32xf32> to vector<8x32xf32>
    %2 = tpu.iota {dimensions = array<i32: 0>} : vector<8x32xi32>
    %c1_i32 = arith.constant 1 : i32
    %3 = tpu.dynamic_rotate %1 by %c1_i32 dim 0 : vector<8x32xf32>, i32 -> vector<8x32xf32>
    %c1_i32_2 = arith.constant 1 : i32
    %4 = vector.broadcast %c1_i32_2 : i32 to vector<8x32xi32>
    %5 = arith.cmpi sge, %2, %4 : vector<8x32xi32>
    %cst = arith.constant 0.000000e+00 : f32
    %6 = vector.broadcast %cst : f32 to vector<8x32xf32>
    %7 = arith.select %5, %3, %6 : vector<8x32xi1>, vector<8x32xf32>
    %8 = arith.addf %1, %7 : vector<8x32xf32>
    %c7_i32 = arith.constant 7 : i32
    %9 = tpu.dynamic_rotate %1 by %c7_i32 dim 0 : vector<8x32xf32>, i32 -> vector<8x32xf32>
    %c7_i32_3 = arith.constant 7 : i32
    %10 = vector.broadcast %c7_i32_3 : i32 to vector<8x32xi32>
    %11 = arith.cmpi slt, %2, %10 : vector<8x32xi32>
    %cst_4 = arith.constant 0.000000e+00 : f32
    %12 = vector.broadcast %cst_4 : f32 to vector<8x32xf32>
    %13 = arith.select %11, %9, %12 : vector<8x32xi1>, vector<8x32xf32>
    %14 = arith.addf %8, %13 : vector<8x32xf32>
    %cst_5 = arith.constant 0.333333343 : f32
    %15 = vector.broadcast %cst_5 : f32 to vector<8x32xf32>
    %16 = arith.mulf %14, %15 : vector<8x32xf32>
    %c0_6 = arith.constant 0 : index
    %c0_7 = arith.constant 0 : index
    %c0_8 = arith.constant 0 : index
    %17 = vector.load %arg2[%c0_6, %c0_7, %c0_8] : memref<1x8x32xf32, #tpu.memory_space<vmem>>, vector<1x8x32xf32>
    %18 = vector.shape_cast %17 : vector<1x8x32xf32> to vector<8x32xf32>
    %19 = vector.shape_cast %16 : vector<8x32xf32> to vector<1x8x32xf32>
    tpu.vector_store %arg2[%c0_6, %c0_7, %c0_8], %19 {strides = array<i32>} : memref<1x8x32xf32, #tpu.memory_space<vmem>>, vector<1x8x32xf32>,
    return
  }
  func.func @transform_0(%arg0: i32) -> (i32, i32, i32) {
    %c0_i32 = arith.constant 0 : i32
    %c0_i32_0 = arith.constant 0 : i32
    %c0_i32_1 = arith.constant 0 : i32
    return %arg0, %c0_i32, %c0_i32_0 : i32, i32, i32
  }
  func.func @transform_1(%arg0: i32) -> (i32, i32, i32) {
    %c0_i32 = arith.constant 0 : i32
    %c0_i32_0 = arith.constant 0 : i32
    %c0_i32_1 = arith.constant 0 : i32
    return %arg0, %c0_i32, %c0_i32_0 : i32, i32, i32
  }
}

</mosaic_0001>

<bundles_post_ra>
// kernel: tpu_custom_call.1
= control target key start
LH: loop header
LB: loop body
LE: loop exit
PB: predicated region body
PF: predicated region fallthrough
CT: control target
= control target key end

     0   :  { %6 = vsyncpa [#allocation3], 0  ;;  %s559_s0 = inlined_call_operand.hbm [shape: f32[2,8,32], index: 0, kind: input, shape index: {}]   ;;  %s560_s1 = inlined_call_operand.hbm [shape: f32[2,8,32], index: 1, kind: output, shape index: {}]  }
   0x1   :  { %8 = vsyncpa [#allocation3 + $0x1], 0 }
   0x2   :  { %9 = vsyncpa [#allocation4], 0 }
   0x3   :  { %11 = vsyncpa [#allocation4 + $0x1], 0  ;;  %s398_s6 = smov 0   ;;  %s400_s7 = smov 0  }
   0x4   :  { %s402_s8 = smov 0   ;;  %s404_s9 = smov 0  }
   0x5 LB: > { %s419_s10 = sadd.s32 4294967295, %s384_s9   ;;  %s230_s11 = sadd.s32 4294967294, %s384_s9   ;;  %s384_s9 = sphi %s404_s9, %s575_s9   ;;  %s380_s8 = sphi %s402_s8, %s574_s8   ;;  %s376_s7 = sphi %s400_s7, %s573_s7   ;;  %s372_s6 = sphi %s398_s6, %s572_s6  }
   0x6   : > { %s423_s12 = sadd.s32 1, %s384_s9   ;;  %s24_s13 = sadd.s32 1, %s380_s8 }
   0x7   : > { %s21_s14 = ssub.s32 %s384_s9, %s423_s12  ;;  %p31_p0 = scmp.ne.s32.totalorder %s380_s8, %s376_s7 }
   0x8   : > { %p22_p1 = scmp.eq.s32.totalorder %s21_s14, 0  ;;  %p32_p2 = scmp.eq.s32.totalorder %s384_s9, 0 }
   0x9   : > { %p37_p3 = scmp.ne.s32.totalorder %s376_s7, %s372_s6  ;;  %p38_p4 = scmp.eq.s32.totalorder %s419_s10, 0 }
   0xa   : > { %s435_s15 = scalar_select %p22_p1, %s380_s8, %s24_s13  }
   0xb   : > { %p437_p5 = por %p32_p2, %p31_p0  ;;  %p441_p6 = por %p38_p4, %p37_p3 }
   0xc   : > { %p61_p7 = scmp.eq.s32.totalorder %s419_s10, 1  ;;  %p67_p8 = scmp.eq.s32.totalorder %s230_s11, 1 }
   0xd   : > { %p254_p10 = scmp.lt.s32.totalorder %s384_s9, 2  ;;  %s87_s20 = sand.u32 1, %s380_s8  }
   0xe   : > { %p448_p11 = por %p61_p7, %p31_p0  ;;  %p452_p12 = por %p67_p8, %p37_p3 }
   0xf   : > { %s234_s21 = sshll.u32 %s384_s9, 7  ;;  %s233_s22 = sshll.u32 %s87_s20, 3 }
  0x10   : > { %s564_s18 = scalar_select %p448_p11, 1, 0 }
  0x11   : > { %s565_s19 = scalar_select %p452_p12, 1, 0 }
  0x12   : > { %s461_s25 = scalar_lea.hbm %s559_s0, %s234_s21  ;;  %s91_s26 = scalar_lea.vmem [#allocation2], %s233_s22 }
  0x13   : > { %s98_s27 = sshll.u32 %s91_s26, 4  ;;  %p465_p13 = pnand %p254_p10, %p437_p5  ;;  %s469_s27 = int_to_ptr.vmem [resolvable:$true] %s98_s27 }
  0x14   : > { %s88_s29 = scalar_lea.sflag [#allocation3], %s87_s20  ;;  %s288_s30 = scalar_lea.hbm %s461_s25, 128 }
  0x15   : > { %p289_p2 = scmp.ne.s32.totalorder %s461_s25, %s288_s30  ;;  %p290_p3 = pneg %p465_p13 }
  0x16   : > { %s293_s4 = scalar_lea.hbm %s559_s0, 256  ;;  %p294_p5 = scmp.lt.u32.totalorder %s461_s25, %s559_s0 }
  0x17   : > { %p291_p4 = pnand %p290_p3, %p289_p2  ;;  %p295_p8 = scmp.lt.u32.totalorder %s293_s4, %s288_s30 }
  0x18   : > { %p297_p9 = scmp.lt.u32.totalorder %s288_s30, %s461_s25 }
  0x19   : > { %p292_p7 = pneg %p291_p4  ;;  %p296_p10 = por %p295_p8, %p294_p5 }
  0x1b   : > { %p298_p0 = por %p297_p9, %p296_p10 }
  0x1d   : > { %p299_p1 = pnand %p298_p0, %p292_p7 }
  0x1f   : > { %302 = shalt.err (!%p299_p1)
}
  0x20   : > { %s303_s13 = scalar_lea.vmem %s469_s27, 128  ;;  %s386_s14 = smov [#allocation2]  }
  0x21   : > { %p304_p2 = scmp.ne.s32.totalorder %s469_s27, %s303_s13  ;;  %s308_s16 = sshll.u32 %s386_s14, 4  ;;  %s309_s16 = int_to_ptr.vmem [resolvable:$false] %s308_s16 }
  0x22   : > { %s310_s20 = scalar_lea.vmem %s309_s16, 256  ;;  %p311_p11 = scmp.lt.s32.totalorder %s469_s27, %s309_s16 }
  0x23   : > { %p306_p4 = pnand %p304_p2, %p290_p3  ;;  %p312_p5 = scmp.lt.s32.totalorder %s310_s20, %s303_s13 }
  0x25   : > { %p307_p12 = pneg %p306_p4  ;;  %p313_p8 = por %p312_p5, %p311_p11 }
  0x27   : > { %p314_p9 = pnand %p313_p8, %p307_p12 }
  0x29   : > { %317 = shalt.err (!%p314_p9)
}
  0x2a   : > { %249 = dma.hbm_to_vmem [thread:$0]  (!%p465_p13), %s461_s25, 128, %s469_s27, %s88_s29  }
  0x2b   : > { %p567_p0 = scmp.lt.s32.totalorder %s384_s9, 3  ;;  %p568_p1 = scmp.ge.s32.totalorder %s384_s9, 1 }
  0x2d   : > { %p104_p3 = pnand %p568_p1, %p567_p0 }
  0x2e   : > { %s503_s21 = sand.u32 (!%p104_p3), 1, %s376_s7  }
  0x2f   : > { %107 = sbr.rel (%p104_p3) target bundleno = 81 (0x51), region = 24  ;;  %s236_s22 = sshll.u32 (!%p104_p3), %s503_s21, 3 }
  0x30   : > { %s110_s23 = scalar_lea.sflag (!%p104_p3), [#allocation3], %s503_s21  ;;  %s113_s24 = scalar_lea.vmem (!%p104_p3), [#allocation2], %s236_s22 }
  0x36   : > { %363 = dma.done.wait (%p441_p6), %s110_s23, 128  }
  0x37   : > { %365 = vsyncadd (%p441_p6), %s110_s23, 4294967168  ;;  %v133_v0 = vlaneseq  ;;  %v132_v2 = vld [vmem:[%s113_s24] sm:$0xff]  ;;  %s131_s25 = scalar_lea.vmem [#allocation5], %s236_s22  ;;  %s239_s27 = sshll.u32 %s419_s10, 7  ;;  %vm144_vm2 = vcmask 261120  }
  0x38   : > { %v135_v3 = vrot.slane %v132_v2, 7  ;;  %v139_v4 = vrot.slane %v132_v2, 1  ;;  %s160_s26 = sshll.u32 %s131_s25, 4  ;;  %s517_s29 = scalar_lea.hbm %s560_s1, %s239_s27  ;;  %s512_s26 = int_to_ptr.vmem [resolvable:$true] %s160_s26 }
  0x39   : > { %v134_v1 = vshrl.u32 %v133_v0, 7  ;;  %s147_s30 = scalar_lea.sflag [#allocation4], %s503_s21  ;;  %s318_s2 = scalar_lea.vmem %s512_s26, 128 }
  0x3a   : > { %p319_p6 = scmp.ne.s32.totalorder %s512_s26, %s318_s2  ;;  %p569_p11 = scmp.ne.s32.totalorder %s564_s18, 0 }
  0x3b   : > { %vm136_vm0 = vcmp.ge.s32.totalorder %v134_v1, 1  ;;  %vm140_vm1 = vcmp.lt.s32.totalorder %v134_v1, 7  ;;  %s387_s10 = smov [#allocation5]  }
  0x3c   : > { %v137_v5 = vsel %vm136_vm0, %v135_v3, 0.0  ;;  %v141_v6 = vsel %vm140_vm1, %v139_v4, 0.0  ;;  %p320_p12 = pnand %p319_p6, %p569_p11  ;;  %s322_s3 = sshll.u32 %s387_s10, 4  ;;  %s323_s3 = int_to_ptr.vmem [resolvable:$false] %s322_s3 }
  0x3d   : > { %v138_v7 = vadd.f32 %v137_v5, %v132_v2  ;;  %s324_s4 = scalar_lea.vmem %s323_s3, 256  ;;  %p325_p7 = scmp.lt.s32.totalorder %s512_s26, %s323_s3 }
  0x3e   : > { %p321_p13 = pneg %p320_p12  ;;  %p326_p10 = scmp.lt.s32.totalorder %s324_s4, %s318_s2 }
  0x3f   : > { %v142_v8 = vadd.f32 %v141_v6, %v138_v7 }
  0x40   : > { %p327_p2 = por %p326_p10, %p325_p7 }
  0x41   : > { %v143_v9 = vmul.f32 0.33333334, %v142_v8 }
  0x42   : > { %p328_p4 = pnand %p327_p2, %p321_p13 }
  0x43   : > { %145 = vst.msk [vmem:[%s131_s25] sm:$0xff] %vm144_vm2, %v143_v9 }
  0x44   : > { %331 = shalt.err (!%p328_p4)
}
  0x45   : > { %s332_s5 = scalar_lea.hbm %s517_s29, 128  ;;  %s336_s14 = scalar_lea.hbm %s560_s1, 256 }
  0x46   : > { %p333_p5 = scmp.ne.s32.totalorder %s517_s29, %s332_s5  ;;  %p337_p0 = scmp.lt.u32.totalorder %s517_s29, %s560_s1 }
  0x47   : > { %p338_p1 = scmp.lt.u32.totalorder %s336_s14, %s332_s5  ;;  %p340_p6 = scmp.lt.u32.totalorder %s332_s5, %s517_s29 }
  0x48   : > { %p334_p8 = pnand %p333_p5, %p569_p11 }
  0x49   : > { %p339_p3 = por %p338_p1, %p337_p0 }
  0x4a   : > { %p335_p9 = pneg %p334_p8 }
  0x4b   : > { %p341_p12 = por %p340_p6, %p339_p3 }
  0x4d   : > { %p342_p13 = pnand %p341_p12, %p335_p9 }
  0x4f   : > { %345 = shalt.err (!%p342_p13)
}
  0x50   : > { %244 = dma.vmem_to_hbm [thread:$0]  (%p569_p11), %s512_s26, 128, %s517_s29, %s147_s30  }
  0x51 PF: > { %s172_s21 = sand.u32 1, %s372_s6   ;;  %p570_p7 = scmp.ne.s32.totalorder %s565_s19, 0 }
  0x52   : > { %p571_p10 = scmp.ge.s32.totalorder %s384_s9, 2  ;;  %s173_s22 = scalar_lea.sflag [#allocation4], %s172_s21 }
  0x54   : > { %p251_p2 = pnand %p571_p10, %p570_p7 }
  0x56   : > { %367 = dma.done.wait (!%p251_p2), %s173_s22, 128  }
  0x57   : > { %369 = vsyncadd (!%p251_p2), %s173_s22, 4294967168  ;;  %p14_p4 = scmp.ge.s32.totalorder %s423_s12, 4   ;;  %s572_s6 = smov %s376_s7 }
  0x58   : > { %s573_s7 = smov %s380_s8  ;;  %s574_s8 = smov %s435_s15 }
  0x59   : > { %s575_s9 = smov %s423_s12  ;;  %16 = sbr.rel (!%p14_p4) target bundleno = 5 (0x5), region = 69 }
  0x60   :  { %178 = vsyncpa [#allocation3], 1 }
  0x61   :  { %180 = vsyncpa [#allocation3 + $0x1], 1 }
  0x62   :  { %181 = vsyncpa [#allocation4], 1 }
  0x63   :  { %183 = vsyncpa [#allocation4 + $0x1], 1 }

</bundles_post_ra>
